<compile_context>
chip_gen: v5e
topology: v5e:2x2
jax: 0.10.0
libtpu: 0.0.40
codegen_flags: <defaults>
</compile_context>

<pallas_src>
import functools

import jax
import jax.numpy as jnp
from jax.experimental import pallas as pl
from jax.experimental.pallas import tpu as pltpu

LANE = 128
SUBLANE = 8


def _round_up(x, m):
    return (x + m - 1) // m * m


def policy_kernel(x_ref, w1_ref, b1_ref, w2_ref, b2_ref, out_ref):
    # fc1 + relu.  K is the real (unpadded) D_in; Mosaic pads the VMEM layout
    # internally, which is cheap and avoids materializing a padded x in HBM.
    h = jnp.dot(x_ref[...], w1_ref[...], preferred_element_type=jnp.float32)
    h = jnp.maximum(h + b1_ref[...], 0.0)

    # fc2 -> raw logits.  Padded output classes carry a -1e30 bias so they act
    # as -inf in the logsumexp below with no explicit masking work.
    z = jnp.dot(h, w2_ref[...], preferred_element_type=jnp.float32) + b2_ref[...]

    # Stable logsumexp (exp/log -> EUP, max/sum -> XLU); emit exact normalized
    # logits only (probs are recovered outside as exp(logits)).
    m = jnp.max(z, axis=-1, keepdims=True)
    e = jnp.exp(z - m)
    s = jnp.sum(e, axis=-1, keepdims=True)
    out_ref[...] = z - (m + jnp.log(s))


@functools.partial(jax.jit, static_argnames=("tb_max",))
def policy_network_forward(x, w1, b1, w2, b2, *, tb_max=1024):
    """x: [B, D_in]; w1: [D_in, H]; b1: [1, H]; w2: [H, D_out]; b2: [1, D_out].

    Returns (normalized_logits, probs), both [B, D_out] float32 — the parameters
    of the Categorical(logits=...) distribution produced by the PyTorch module.
    """
    B, D_in = x.shape
    H = w1.shape[1]
    D_out = w2.shape[1]

    H_p = _round_up(H, LANE)
    D_out_p = _round_up(D_out, LANE)

    # Batch tiling: enough steps that (a) each tile is <= tb_max rows and
    # (b) mid/large batches give >= 2 grid steps so both v7x TensorCores work;
    # TB is chosen from ceil(B / n_steps) so row padding stays minimal.
    n_steps = -(-B // tb_max)
    if B >= 256 and n_steps < 2:
        n_steps = 2
    TB = _round_up(-(-B // n_steps), SUBLANE)
    B_p = _round_up(B, TB)
    grid = (B_p // TB,)

    f32 = jnp.float32
    x_in = x.astype(f32)
    if B_p != B:  # pad rows only when needed (never the lane dim)
        x_in = jnp.zeros((B_p, D_in), f32).at[:B].set(x_in)

    # Tiny weight pads (constant work under jit).
    w1_p = jnp.zeros((D_in, H_p), f32).at[:, :H].set(w1.astype(f32))
    b1_p = jnp.zeros((1, H_p), f32).at[:, :H].set(b1.astype(f32))
    w2_p = jnp.zeros((H_p, D_out_p), f32).at[:H, :D_out].set(w2.astype(f32))
    # Padded classes: huge negative bias -> exp underflows to 0 in the logsumexp.
    b2_p = jnp.full((1, D_out_p), -1e30, f32).at[:, :D_out].set(b2.astype(f32))

    flops = 2 * B_p * (D_in * H_p + H_p * D_out_p)
    transcendentals = B_p * (D_out_p + 1)  # exp per class + log per row
    bytes_accessed = 4 * (B_p * D_in + D_in * H_p + H_p
                          + H_p * D_out_p + D_out_p + B_p * D_out_p)

    out = pl.pallas_call(
        policy_kernel,
        out_shape=jax.ShapeDtypeStruct((B_p, D_out_p), f32),
        grid=grid,
        in_specs=[
            pl.BlockSpec((TB, D_in), lambda i: (i, 0)),     # batch stream, no lane pad
            pl.BlockSpec((D_in, H_p), lambda i: (0, 0)),    # VMEM-resident weights
            pl.BlockSpec((1, H_p), lambda i: (0, 0)),
            pl.BlockSpec((H_p, D_out_p), lambda i: (0, 0)),
            pl.BlockSpec((1, D_out_p), lambda i: (0, 0)),
        ],
        out_specs=pl.BlockSpec((TB, D_out_p), lambda i: (i, 0)),
        compiler_params=pltpu.CompilerParams(
            dimension_semantics=("parallel",),              # both TCs on v7x
        ),
        cost_estimate=pl.CostEstimate(
            flops=flops,
            transcendentals=transcendentals,
            bytes_accessed=bytes_accessed,
        ),
    )(x_in, w1_p, b1_p, w2_p, b2_p)

    logits = out[:B, :D_out]
    # Probabilities from the exact normalized logits (tiny [B, D_out] op outside
    # the kernel; sums to 1 within f32 rounding — no approximate reciprocal).
    probs = jnp.exp(logits)
    return logits, probs


def init_linear_params(key, in_features, out_features):
    """Deterministic nn.Linear-style init: U(-1/sqrt(in), 1/sqrt(in))."""
    kw, kb = jax.random.split(key)
    bound = 1.0 / jnp.sqrt(jnp.float32(in_features))
    # Stored transposed relative to PyTorch ([out, in] -> [in, out]) for the kernel.
    w = jax.random.uniform(kw, (in_features, out_features), jnp.float32, -bound, bound)
    b = jax.random.uniform(kb, (1, out_features), jnp.float32, -bound, bound)
    return w, b


if __name__ == "__main__":
    key = jax.random.PRNGKey(0)
    k_x, k_fc1, k_fc2 = jax.random.split(key, 3)

    batch, input_dim, hidden_dim, output_dim = 8, 16, 32, 8

    x = jax.random.normal(k_x, (batch, input_dim), dtype=jnp.float32)
    w1, b1 = init_linear_params(k_fc1, input_dim, hidden_dim)
    w2, b2 = init_linear_params(k_fc2, hidden_dim, output_dim)

    logits, probs = policy_network_forward(x, w1, b1, w2, b2)
    jax.block_until_ready((logits, probs))

    # Pure-JAX reference for sanity.
    h_ref = jnp.maximum(x @ w1 + b1, 0.0)
    z_ref = h_ref @ w2 + b2
    logits_ref = z_ref - jax.scipy.special.logsumexp(z_ref, axis=-1, keepdims=True)
    probs_ref = jax.nn.softmax(z_ref, axis=-1)

    assert logits.shape == (batch, output_dim) and probs.shape == (batch, output_dim)
    assert jnp.allclose(logits, logits_ref, atol=2e-3, rtol=2e-3)
    assert jnp.allclose(probs, probs_ref, atol=2e-3, rtol=2e-3)
    # probs = exp(exact normalized logits) -> sums to 1 up to f32 rounding.
    assert jnp.allclose(jnp.sum(probs, axis=-1), 1.0, atol=1e-4)

    print("KERNEL_OK")
</pallas_src>

<mosaic_0001>
module attributes {stable_mosaic.version = 11 : i64} {
  func.func @policy_kernel(%arg0: i32, %arg1: memref<8x16xf32, #tpu.memory_space<vmem>>, %arg2: memref<16x128xf32, #tpu.memory_space<vmem>>, %arg3: memref<1x128xf32, #tpu.memory_space<vmem>>, %arg4: memref<128x128xf32, #tpu.memory_space<vmem>>, %arg5: memref<1x128xf32, #tpu.memory_space<vmem>>, %arg6: memref<8x128xf32, #tpu.memory_space<vmem>>) attributes {dimension_semantics = [#tpu.dimension_semantics<parallel>], iteration_bounds = array<i64: 1>, scalar_prefetch = 0 : i64, scratch_operands = 0 : i64, tpu.core_type = #tpu.core_type<tc>, window_params = [{transform_indices = @transform_0, window_bounds = array<i64: 8, 16>}, {pipeline_mode = #tpu.pipeline_mode<synchronous>, transform_indices = @transform_1, window_bounds = array<i64: 16, 128>}, {pipeline_mode = #tpu.pipeline_mode<synchronous>, transform_indices = @transform_2, window_bounds = array<i64: 1, 128>}, {pipeline_mode = #tpu.pipeline_mode<synchronous>, transform_indices = @transform_3, window_bounds = array<i64: 128, 128>}, {pipeline_mode = #tpu.pipeline_mode<synchronous>, transform_indices = @transform_4, window_bounds = array<i64: 1, 128>}, {transform_indices = @transform_5, window_bounds = array<i64: 8, 128>}]} {
    %c0 = arith.constant 0 : index
    %c0_0 = arith.constant 0 : index
    %0 = vector.load %arg1[%c0, %c0_0] : memref<8x16xf32, #tpu.memory_space<vmem>>, vector<8x16xf32>
    %c0_1 = arith.constant 0 : index
    %c0_2 = arith.constant 0 : index
    %1 = vector.load %arg2[%c0_1, %c0_2] : memref<16x128xf32, #tpu.memory_space<vmem>>, vector<16x128xf32>
    %cst = arith.constant dense<0.000000e+00> : vector<8x128xf32>
    %2 = tpu.matmul %0, %1, %cst {dimension_numbers = #tpu.dot_dimension_numbers<[1], [0], [0], [1], [0, 0, 1, 1], [], []>} : vector<8x16xf32>, vector<16x128xf32>, vector<8x128xf32> -> vector<8x128xf32>
    %c0_3 = arith.constant 0 : index
    %c0_4 = arith.constant 0 : index
    %3 = vector.load %arg3[%c0_3, %c0_4] : memref<1x128xf32, #tpu.memory_space<vmem>>, vector<1x128xf32>
    %4 = vector.broadcast %3 : vector<1x128xf32> to vector<8x128xf32>
    %5 = arith.addf %2, %4 : vector<8x128xf32>
    %cst_5 = arith.constant 0.000000e+00 : f32
    %6 = vector.broadcast %cst_5 : f32 to vector<8x128xf32>
    %7 = arith.maximumf %5, %6 : vector<8x128xf32>
    %c0_6 = arith.constant 0 : index
    %c0_7 = arith.constant 0 : index
    %8 = vector.load %arg4[%c0_6, %c0_7] : memref<128x128xf32, #tpu.memory_space<vmem>>, vector<128x128xf32>
    %cst_8 = arith.constant dense<0.000000e+00> : vector<8x128xf32>
    %9 = tpu.matmul %7, %8, %cst_8 {dimension_numbers = #tpu.dot_dimension_numbers<[1], [0], [0], [1], [0, 0, 1, 1], [], []>} : vector<8x128xf32>, vector<128x128xf32>, vector<8x128xf32> -> vector<8x128xf32>
    %c0_9 = arith.constant 0 : index
    %c0_10 = arith.constant 0 : index
    %10 = vector.load %arg5[%c0_9, %c0_10] : memref<1x128xf32, #tpu.memory_space<vmem>>, vector<1x128xf32>
    %11 = vector.broadcast %10 : vector<1x128xf32> to vector<8x128xf32>
    %12 = arith.addf %9, %11 : vector<8x128xf32>
    %cst_11 = arith.constant dense<0xFF800000> : vector<8xf32>
    %13 = vector.multi_reduction <maximumf>, %12, %cst_11 [1] : vector<8x128xf32> to vector<8xf32>
    %14 = vector.shape_cast %13 : vector<8xf32> to vector<8x1xf32>
    %15 = vector.broadcast %14 : vector<8x1xf32> to vector<8x128xf32>
    %16 = arith.subf %12, %15 : vector<8x128xf32>
    %17 = math.exp %16 : vector<8x128xf32>
    %cst_12 = arith.constant dense<0.000000e+00> : vector<8xf32>
    %18 = vector.multi_reduction <add>, %17, %cst_12 [1] : vector<8x128xf32> to vector<8xf32>
    %19 = vector.shape_cast %18 : vector<8xf32> to vector<8x1xf32>
    %20 = math.log %19 : vector<8x1xf32>
    %21 = arith.addf %14, %20 : vector<8x1xf32>
    %22 = vector.broadcast %21 : vector<8x1xf32> to vector<8x128xf32>
    %23 = arith.subf %12, %22 : vector<8x128xf32>
    %c0_13 = arith.constant 0 : index
    %c0_14 = arith.constant 0 : index
    %24 = vector.load %arg6[%c0_13, %c0_14] : memref<8x128xf32, #tpu.memory_space<vmem>>, vector<8x128xf32>
    tpu.vector_store %arg6[%c0_13, %c0_14], %23 {strides = array<i32>} : memref<8x128xf32, #tpu.memory_space<vmem>>, vector<8x128xf32>,
    return
  }
  func.func @transform_0(%arg0: i32) -> (i32, i32) {
    %c0_i32 = arith.constant 0 : i32
    %c0_i32_0 = arith.constant 0 : i32
    return %arg0, %c0_i32 : i32, i32
  }
  func.func @transform_1(%arg0: i32) -> (i32, i32) {
    %c0_i32 = arith.constant 0 : i32
    %c0_i32_0 = arith.constant 0 : i32
    %c0_i32_1 = arith.constant 0 : i32
    return %c0_i32, %c0_i32_0 : i32, i32
  }
  func.func @transform_2(%arg0: i32) -> (i32, i32) {
    %c0_i32 = arith.constant 0 : i32
    %c0_i32_0 = arith.constant 0 : i32
    %c0_i32_1 = arith.constant 0 : i32
    return %c0_i32, %c0_i32_0 : i32, i32
  }
  func.func @transform_3(%arg0: i32) -> (i32, i32) {
    %c0_i32 = arith.constant 0 : i32
    %c0_i32_0 = arith.constant 0 : i32
    %c0_i32_1 = arith.constant 0 : i32
    return %c0_i32, %c0_i32_0 : i32, i32
  }
  func.func @transform_4(%arg0: i32) -> (i32, i32) {
    %c0_i32 = arith.constant 0 : i32
    %c0_i32_0 = arith.constant 0 : i32
    %c0_i32_1 = arith.constant 0 : i32
    return %c0_i32, %c0_i32_0 : i32, i32
  }
  func.func @transform_5(%arg0: i32) -> (i32, i32) {
    %c0_i32 = arith.constant 0 : i32
    %c0_i32_0 = arith.constant 0 : i32
    return %arg0, %c0_i32 : i32, i32
  }
}

</mosaic_0001>

<bundles_post_ra>
// kernel: policy_network_forward.1
= control target key start
LH: loop header
LB: loop body
LE: loop exit
PB: predicated region body
PF: predicated region fallthrough
CT: control target
= control target key end

     0   :  { %vm27_vm0 = vcmask 130048   ;;  %s211_s1 = inlined_call_operand.vmem [shape: f32[16,128], index: 1, kind: input, shape index: {}]   ;;  %s212_s0 = inlined_call_operand.vmem [shape: f32[8,16], index: 0, kind: input, shape index: {}]   ;;  %s213_s3 = inlined_call_operand.vmem [shape: f32[128,128], index: 3, kind: input, shape index: {}]   ;;  %s214_s2 = inlined_call_operand.vmem [shape: f32[1,128], index: 2, kind: input, shape index: {}]   ;;  %s215_s4 = inlined_call_operand.vmem [shape: f32[1,128], index: 4, kind: input, shape index: {}]   ;;  %s216_s5 = inlined_call_operand.vmem [shape: f32[8,128], index: 5, kind: output, shape index: {}]  }
   0x1   :  { %v22_v0 = vld [vmem:[%s211_s1 + $0x8] sm:$0xff]  ;;  %v21_v1 = vld [vmem:[%s211_s1] sm:$0xff]  ;;  %v67_v3 = vld [vmem:[%s213_s3 + $0x78] sm:$0xff] }
   0x2   :  { %45 = vmatpush.msra.mxu0 %v22_v0  ;;  %v20_v2 = vld [vmem:[%s212_s0] sm:$0xff]  ;;  %v66_v4 = vld [vmem:[%s213_s3 + $0x70] sm:$0xff]  ;;  %72 = vmatpush.msra.mxu1 %v67_v3  ;;  %v65_v5 = vld [vmem:[%s213_s3 + $0x68] sm:$0xff] }
   0x3   :  { %v64_v6 = vld [vmem:[%s213_s3 + $0x60] sm:$0xff]  ;;  %v63_v7 = vld [vmem:[%s213_s3 + $0x58] sm:$0xff]  ;;  %v62_v8 = vld [vmem:[%s213_s3 + $0x50] sm:$0xff] }
   0x4   :  { %46 = vmatpush.msra.mxu0 %v21_v1  ;;  %73 = vmatpush.msra.mxu1 %v66_v4  ;;  %v61_v9 = vld [vmem:[%s213_s3 + $0x48] sm:$0xff]  ;;  %v60_v10 = vld [vmem:[%s213_s3 + $0x40] sm:$0xff]  ;;  %v59_v11 = vld [vmem:[%s213_s3 + $0x38] sm:$0xff] }
   0x5   :  { %108 = vmatmul.msk.f32.vlgmr.msra.gmra.mxu0 %vm27_vm0, %v20_v2  ;;  %v58_v12 = vld [vmem:[%s213_s3 + $0x30] sm:$0xff]  ;;  %v57_v13 = vld [vmem:[%s213_s3 + $0x28] sm:$0xff]  ;;  %v56_v14 = vld [vmem:[%s213_s3 + $0x20] sm:$0xff] }
   0x6   :  { %74 = vmatpush.msra.mxu1 %v65_v5  ;;  %v55_v15 = vld [vmem:[%s213_s3 + $0x18] sm:$0xff]  ;;  %v54_v16 = vld [vmem:[%s213_s3 + $0x10] sm:$0xff]  ;;  %v53_v17 = vld [vmem:[%s213_s3 + $0x8] sm:$0xff] }
   0x7   :  { %v52_v18 = vld [vmem:[%s213_s3] sm:$0xff] }
   0x8   :  { %75 = vmatpush.msra.mxu1 %v64_v6  ;;  %v109_v19 = vld [vmem:[%s214_s2] ss:$0 sm:$0xff] }
   0x9   :  { %v110_v23 = vld [vmem:[%s215_s4] ss:$0 sm:$0xff] }
   0xa   :  { %76 = vmatpush.msra.mxu1 %v63_v7 }
   0xc   :  { %77 = vmatpush.msra.mxu1 %v62_v8 }
   0xe   :  { %78 = vmatpush.msra.mxu1 %v61_v9 }
  0x10   :  { %79 = vmatpush.msra.mxu1 %v60_v10 }
  0x12   :  { %80 = vmatpush.msra.mxu1 %v59_v11 }
  0x14   :  { %81 = vmatpush.msra.mxu1 %v58_v12 }
  0x16   :  { %82 = vmatpush.msra.mxu1 %v57_v13 }
  0x18   :  { %83 = vmatpush.msra.mxu1 %v56_v14 }
  0x1a   :  { %84 = vmatpush.msra.mxu1 %v55_v15 }
  0x1c   :  { %85 = vmatpush.msra.mxu1 %v54_v16 }
  0x1e   :  { %86 = vmatpush.msra.mxu1 %v53_v17 }
  0x20   :  { %87 = vmatpush.msra.mxu1 %v52_v18 }
  0x82   :  { %v48_v20 = vpop.f32.mrf.mxu0 }
  0x83   :  { %v49_v21 = vadd.f32 %v109_v19, %v48_v20 }
  0x85   :  { %v51_v22 = vmax.f32 %v49_v21, 0.0 }
  0x87   :  { %88 = vmatmul.f32.vlgmr.msra.gmra.mxu1 %v51_v22 }
 0x104   :  { %v89_v24 = vpop.f32.mrf.mxu1 }
 0x105   :  { %v90_v25 = vadd.f32 %v110_v23, %v89_v24 }
 0x107   :  { %92 = vmax.xlane.f32.xlu0 %v90_v25 }
 0x17a   :  { %v93_v26 = vpop.xlane.xlu0 %92 }
 0x17b   :  { %v94_v27 = vsub.f32 %v90_v25, %v93_v26 }
 0x17d   :  { %v95_v28 = vmul.f32 1.442695, %v94_v27 }
 0x17f   :  { %111 = vpow2.f32 %v95_v28 }
 0x185   :  { %v112_v29 = vpop.eup %111 }
 0x186   :  { %97 = vadd.xlane.f32.xlu0 %v112_v29 }
 0x1f9   :  { %v98_v30 = vpop.xlane.xlu0 %97 }
 0x1fa   :  { %113 = vlog2.f32 %v98_v30 }
 0x200   :  { %v114_v31 = vpop.eup %113 }
 0x201   :  { %v100_v32 = vmul.f32 0.6931472, %v114_v31 }
 0x203   :  { %v101_v33 = vadd.f32 %v100_v32, %v93_v26 }
 0x205   :  { %v102_v34 = vsub.f32 %v90_v25, %v101_v33 }
 0x207   :  { %103 = vst [vmem:[%s216_s5] sm:$0xff] %v102_v34 }

</bundles_post_ra>
